<compile_context>
chip_gen: v5e
topology: v5e:2x2
jax: 0.10.0
libtpu: 0.0.40
codegen_flags: <defaults>
</compile_context>

<pallas_src>
import functools

import jax
import jax.numpy as jnp
from jax.experimental import pallas as pl
from jax.experimental.pallas import tpu as pltpu

LANE = 128


# ---------------------------------------------------------------------------
# Kernel 1: per-pixel softmax stats (lane-dense, channels walked in-registers)
#   logits_ref: (C, TROWS, 128)  (any float dtype; cast to f32 in-kernel)
#   tgt_ref   : (TROWS, 128) int32
#   stats_ref : (3, TROWS, 128) f32  [0]=ce  [1]=prob(target)  [2]=valid
# ---------------------------------------------------------------------------
def _pixel_stats_kernel(logits_ref, tgt_ref, stats_ref, *, ignore_index,
                        num_classes):
    t = tgt_ref[...]                              # (TROWS, 128) int32
    valid = t != ignore_index
    t_cl = jnp.where(valid, t, 0)                 # clamp ignored -> class 0

    # channel max: unrolled elementwise loop over full (TROWS,128) vreg slabs
    m = logits_ref[0].astype(jnp.float32)
    for ci in range(1, num_classes):
        m = jnp.maximum(m, logits_ref[ci].astype(jnp.float32))

    # exp-sum + target-class gather fused into the same channel loop
    s = jnp.zeros_like(m)
    x_t = jnp.zeros_like(m)
    ex_t = jnp.zeros_like(m)
    for ci in range(num_classes):
        xc = logits_ref[ci].astype(jnp.float32)
        exc = jnp.exp(xc - m)
        s = s + exc
        sel = t_cl == ci
        x_t = jnp.where(sel, xc, x_t)
        ex_t = jnp.where(sel, exc, ex_t)

    lse = jnp.log(s) + m
    ce = lse - x_t                                     # -log softmax(x)[target]
    p_t = ex_t * pl.reciprocal(s, approx=True)         # softmax prob of target

    stats_ref[0] = ce
    stats_ref[1] = jnp.where(valid, p_t, 1.0)          # invalid pixels -> prob 1
    stats_ref[2] = valid.astype(jnp.float32)


# ---------------------------------------------------------------------------
# Kernel 2: OHEM reduction -> per-block lane-dense partial sums
#   thr_ref  : (1,) f32 in SMEM (OHEM probability threshold)
#   stats_ref: (3, TROWS, 128) f32
#   out_ref  : (8, 128) f32 per block:
#     row 0 = sum(ce * valid)        row 1 = sum(valid)
#     row 2 = sum(ce * valid * kept) row 3 = sum(valid * kept)
#     rows 4..7 = 0
# ---------------------------------------------------------------------------
def _ohem_reduce_kernel(thr_ref, stats_ref, out_ref):
    thr = thr_ref[0]
    ce = stats_ref[0]
    prob = stats_ref[1]
    valid = stats_ref[2]

    kept = valid * (prob <= thr).astype(jnp.float32)
    ce_valid = ce * valid
    ce_kept = ce * kept

    out_ref[...] = jnp.concatenate(
        [jnp.sum(ce_valid, axis=0, keepdims=True),
         jnp.sum(valid, axis=0, keepdims=True),
         jnp.sum(ce_kept, axis=0, keepdims=True),
         jnp.sum(kept, axis=0, keepdims=True),
         jnp.zeros((4, ce.shape[-1]), jnp.float32)],
        axis=0)


# ---------------------------------------------------------------------------
# Wrapper reproducing OhemCrossEntropy2d.forward / MixSoftmaxCrossEntropyOHEMLoss
# ---------------------------------------------------------------------------
def mix_softmax_ce_ohem_loss(pred, target, *, ignore_index=-1, thresh=0.7,
                             min_kept=100000, aux=False, aux_weight=0.4):
    """pred: (N, C, H, W) float logits; target: (N, H, W) int labels.
    Returns {'loss': scalar} matching MixSoftmaxCrossEntropyOHEMLoss(aux=False)."""
    del aux, aux_weight
    # TODO(synk): aux=True path in the reference uses an undefined `inputs`
    # (buggy upstream); only the aux=False path is implemented.
    # TODO(synk): use_weight=True per-class weights not implemented (default path).

    n, c, h, w = pred.shape
    hw = h * w
    P = n * hw

    rows = -(-hw // LANE)                                  # 128-pixel rows per image
    TROWS = 64 if rows >= 64 else -(-rows // 8) * 8        # up to 8192 px / grid step
    nblk = -(-rows // TROWS)
    rows_pad = nblk * TROWS
    hw_pad = rows_pad * LANE

    # Free reshape (no NHWC transpose). Keep pred's dtype (bf16 stays bf16 in
    # HBM; cast to f32 inside the kernel).
    logits = pred.reshape(n, c, hw)
    tgt = target.reshape(n, hw).astype(jnp.int32)
    if hw_pad != hw:
        logits = jnp.pad(logits, ((0, 0), (0, 0), (0, hw_pad - hw)))
        tgt = jnp.pad(tgt, ((0, 0), (0, hw_pad - hw)),
                      constant_values=ignore_index)
    logits = logits.reshape(n, c, rows_pad, LANE)
    tgt = tgt.reshape(n, rows_pad, LANE)

    grid = (n, nblk)

    stats = pl.pallas_call(
        functools.partial(_pixel_stats_kernel, ignore_index=ignore_index,
                          num_classes=c),
        out_shape=jax.ShapeDtypeStruct((n, 3, rows_pad, LANE), jnp.float32),
        grid=grid,
        in_specs=[pl.BlockSpec((None, c, TROWS, LANE), lambda b, i: (b, 0, i, 0)),
                  pl.BlockSpec((None, TROWS, LANE), lambda b, i: (b, i, 0))],
        out_specs=pl.BlockSpec((None, 3, TROWS, LANE), lambda b, i: (b, 0, i, 0)),
        compiler_params=pltpu.CompilerParams(
            dimension_semantics=("parallel", "parallel")),
    )(logits, tgt)

    # --- OHEM threshold: k-th smallest prob over the real (unpadded) pixels ---
    # TODO(synk): k-th order statistic has no clean Pallas equivalent; uses
    # jax.lax.top_k in glue (equivalent to argsort()[min_kept-1], far cheaper
    # than a full sort).
    prob_flat = stats[:, 1, :, :].reshape(n, hw_pad)[:, :hw].reshape(-1)
    if min_kept > 0:
        k = min(P, int(min_kept))
        kth = -jax.lax.top_k(-prob_flat, k)[0][k - 1]
        threshold = jnp.maximum(kth, jnp.float32(thresh))
    else:
        threshold = jnp.float32(thresh)
    thr = threshold.reshape(1).astype(jnp.float32)

    partials = pl.pallas_call(
        _ohem_reduce_kernel,
        out_shape=jax.ShapeDtypeStruct((n, nblk, 8, LANE), jnp.float32),
        grid=grid,
        in_specs=[pl.BlockSpec(memory_space=pltpu.MemorySpace.SMEM),
                  pl.BlockSpec((None, 3, TROWS, LANE), lambda b, i: (b, 0, i, 0))],
        out_specs=pl.BlockSpec((None, None, 8, LANE), lambda b, i: (b, i, 0, 0)),
        compiler_params=pltpu.CompilerParams(
            dimension_semantics=("parallel", "parallel")),
    )(thr, stats)

    sums = jnp.sum(partials, axis=(0, 1, 3))            # (8,) tiny final reduce
    sum_ce_valid, num_valid = sums[0], sums[1]
    sum_ce_kept, num_kept = sums[2], sums[3]

    # torch: `if min_kept > num_valid` -> plain CE over valid pixels (no OHEM);
    #        `elif num_valid > 0`      -> OHEM-masked CE.
    apply_ohem = jnp.logical_and(num_valid >= jnp.float32(min_kept),
                                 num_valid > 0)
    num = jnp.where(apply_ohem, sum_ce_kept, sum_ce_valid)
    den = jnp.where(apply_ohem, num_kept, num_valid)

    # CrossEntropyLoss(reduction='mean', ignore_index): sum over kept / count kept
    loss = num / den
    return dict(loss=loss)


if __name__ == "__main__":
    key = jax.random.PRNGKey(0)
    k_pred, k_tgt = jax.random.split(key)

    N, C, H, W = 2, 4, 16, 16
    pred = jax.random.normal(k_pred, (N, C, H, W), dtype=jnp.float32)
    # labels in [-1, C-1]; -1 == ignore_index
    target = jax.random.randint(k_tgt, (N, H, W), minval=-1, maxval=C,
                                dtype=jnp.int32)

    # min_kept reduced so the OHEM branch is actually exercised at this small size
    out = mix_softmax_ce_ohem_loss(pred, target,
                                   ignore_index=-1, thresh=0.7, min_kept=64)
    loss = jax.block_until_ready(out["loss"])
    assert loss.shape == () and bool(jnp.isfinite(loss))
    print("KERNEL_OK")
</pallas_src>

<mosaic_0001>
module attributes {stable_mosaic.version = 11 : i64} {
  func.func @_pixel_stats_kernel(%arg0: i32, %arg1: i32, %arg2: memref<1x4x8x128xf32, #tpu.memory_space<vmem>>, %arg3: memref<1x8x128xi32, #tpu.memory_space<vmem>>, %arg4: memref<1x3x8x128xf32, #tpu.memory_space<vmem>>) attributes {dimension_semantics = [#tpu.dimension_semantics<parallel>, #tpu.dimension_semantics<parallel>], iteration_bounds = array<i64: 2, 1>, scalar_prefetch = 0 : i64, scratch_operands = 0 : i64, tpu.core_type = #tpu.core_type<tc>, window_params = [{transform_indices = @transform_0, window_bounds = array<i64: 1, 4, 8, 128>}, {transform_indices = @transform_1, window_bounds = array<i64: 1, 8, 128>}, {transform_indices = @transform_2, window_bounds = array<i64: 1, 3, 8, 128>}]} {
    %c0 = arith.constant 0 : index
    %c0_0 = arith.constant 0 : index
    %c0_1 = arith.constant 0 : index
    %0 = vector.load %arg3[%c0, %c0_0, %c0_1] : memref<1x8x128xi32, #tpu.memory_space<vmem>>, vector<1x8x128xi32>
    %1 = vector.shape_cast %0 : vector<1x8x128xi32> to vector<8x128xi32>
    %c-1_i32 = arith.constant -1 : i32
    %2 = vector.broadcast %c-1_i32 : i32 to vector<8x128xi32>
    %3 = arith.cmpi ne, %1, %2 : vector<8x128xi32>
    %c0_i32 = arith.constant 0 : i32
    %4 = vector.broadcast %c0_i32 : i32 to vector<8x128xi32>
    %5 = arith.select %3, %1, %4 : vector<8x128xi1>, vector<8x128xi32>
    %c0_2 = arith.constant 0 : index
    %c0_3 = arith.constant 0 : index
    %c0_4 = arith.constant 0 : index
    %c0_5 = arith.constant 0 : index
    %6 = vector.load %arg2[%c0_2, %c0_3, %c0_4, %c0_5] : memref<1x4x8x128xf32, #tpu.memory_space<vmem>>, vector<1x1x8x128xf32>
    %7 = vector.shape_cast %6 : vector<1x1x8x128xf32> to vector<8x128xf32>
    %c0_6 = arith.constant 0 : index
    %c1 = arith.constant 1 : index
    %c0_7 = arith.constant 0 : index
    %c0_8 = arith.constant 0 : index
    %8 = vector.load %arg2[%c0_6, %c1, %c0_7, %c0_8] : memref<1x4x8x128xf32, #tpu.memory_space<vmem>>, vector<1x1x8x128xf32>
    %9 = vector.shape_cast %8 : vector<1x1x8x128xf32> to vector<8x128xf32>
    %10 = arith.maximumf %7, %9 : vector<8x128xf32>
    %c0_9 = arith.constant 0 : index
    %c2 = arith.constant 2 : index
    %c0_10 = arith.constant 0 : index
    %c0_11 = arith.constant 0 : index
    %11 = vector.load %arg2[%c0_9, %c2, %c0_10, %c0_11] : memref<1x4x8x128xf32, #tpu.memory_space<vmem>>, vector<1x1x8x128xf32>
    %12 = vector.shape_cast %11 : vector<1x1x8x128xf32> to vector<8x128xf32>
    %13 = arith.maximumf %10, %12 : vector<8x128xf32>
    %c0_12 = arith.constant 0 : index
    %c3 = arith.constant 3 : index
    %c0_13 = arith.constant 0 : index
    %c0_14 = arith.constant 0 : index
    %14 = vector.load %arg2[%c0_12, %c3, %c0_13, %c0_14] : memref<1x4x8x128xf32, #tpu.memory_space<vmem>>, vector<1x1x8x128xf32>
    %15 = vector.shape_cast %14 : vector<1x1x8x128xf32> to vector<8x128xf32>
    %16 = arith.maximumf %13, %15 : vector<8x128xf32>
    %cst = arith.constant 0.000000e+00 : f32
    %17 = vector.broadcast %cst : f32 to vector<8x128xf32>
    %cst_15 = arith.constant 0.000000e+00 : f32
    %18 = vector.broadcast %cst_15 : f32 to vector<8x128xf32>
    %cst_16 = arith.constant 0.000000e+00 : f32
    %19 = vector.broadcast %cst_16 : f32 to vector<8x128xf32>
    %c0_17 = arith.constant 0 : index
    %c0_18 = arith.constant 0 : index
    %c0_19 = arith.constant 0 : index
    %c0_20 = arith.constant 0 : index
    %20 = vector.load %arg2[%c0_17, %c0_18, %c0_19, %c0_20] : memref<1x4x8x128xf32, #tpu.memory_space<vmem>>, vector<1x1x8x128xf32>
    %21 = vector.shape_cast %20 : vector<1x1x8x128xf32> to vector<8x128xf32>
    %22 = arith.subf %21, %16 : vector<8x128xf32>
    %23 = math.exp %22 : vector<8x128xf32>
    %24 = arith.addf %17, %23 : vector<8x128xf32>
    %c0_i32_21 = arith.constant 0 : i32
    %25 = vector.broadcast %c0_i32_21 : i32 to vector<8x128xi32>
    %26 = arith.cmpi eq, %5, %25 : vector<8x128xi32>
    %27 = arith.select %26, %21, %18 : vector<8x128xi1>, vector<8x128xf32>
    %28 = arith.select %26, %23, %19 : vector<8x128xi1>, vector<8x128xf32>
    %c0_22 = arith.constant 0 : index
    %c1_23 = arith.constant 1 : index
    %c0_24 = arith.constant 0 : index
    %c0_25 = arith.constant 0 : index
    %29 = vector.load %arg2[%c0_22, %c1_23, %c0_24, %c0_25] : memref<1x4x8x128xf32, #tpu.memory_space<vmem>>, vector<1x1x8x128xf32>
    %30 = vector.shape_cast %29 : vector<1x1x8x128xf32> to vector<8x128xf32>
    %31 = arith.subf %30, %16 : vector<8x128xf32>
    %32 = math.exp %31 : vector<8x128xf32>
    %33 = arith.addf %24, %32 : vector<8x128xf32>
    %c1_i32 = arith.constant 1 : i32
    %34 = vector.broadcast %c1_i32 : i32 to vector<8x128xi32>
    %35 = arith.cmpi eq, %5, %34 : vector<8x128xi32>
    %36 = arith.select %35, %30, %27 : vector<8x128xi1>, vector<8x128xf32>
    %37 = arith.select %35, %32, %28 : vector<8x128xi1>, vector<8x128xf32>
    %c0_26 = arith.constant 0 : index
    %c2_27 = arith.constant 2 : index
    %c0_28 = arith.constant 0 : index
    %c0_29 = arith.constant 0 : index
    %38 = vector.load %arg2[%c0_26, %c2_27, %c0_28, %c0_29] : memref<1x4x8x128xf32, #tpu.memory_space<vmem>>, vector<1x1x8x128xf32>
    %39 = vector.shape_cast %38 : vector<1x1x8x128xf32> to vector<8x128xf32>
    %40 = arith.subf %39, %16 : vector<8x128xf32>
    %41 = math.exp %40 : vector<8x128xf32>
    %42 = arith.addf %33, %41 : vector<8x128xf32>
    %c2_i32 = arith.constant 2 : i32
    %43 = vector.broadcast %c2_i32 : i32 to vector<8x128xi32>
    %44 = arith.cmpi eq, %5, %43 : vector<8x128xi32>
    %45 = arith.select %44, %39, %36 : vector<8x128xi1>, vector<8x128xf32>
    %46 = arith.select %44, %41, %37 : vector<8x128xi1>, vector<8x128xf32>
    %c0_30 = arith.constant 0 : index
    %c3_31 = arith.constant 3 : index
    %c0_32 = arith.constant 0 : index
    %c0_33 = arith.constant 0 : index
    %47 = vector.load %arg2[%c0_30, %c3_31, %c0_32, %c0_33] : memref<1x4x8x128xf32, #tpu.memory_space<vmem>>, vector<1x1x8x128xf32>
    %48 = vector.shape_cast %47 : vector<1x1x8x128xf32> to vector<8x128xf32>
    %49 = arith.subf %48, %16 : vector<8x128xf32>
    %50 = math.exp %49 : vector<8x128xf32>
    %51 = arith.addf %42, %50 : vector<8x128xf32>
    %c3_i32 = arith.constant 3 : i32
    %52 = vector.broadcast %c3_i32 : i32 to vector<8x128xi32>
    %53 = arith.cmpi eq, %5, %52 : vector<8x128xi32>
    %54 = arith.select %53, %48, %45 : vector<8x128xi1>, vector<8x128xf32>
    %55 = arith.select %53, %50, %46 : vector<8x128xi1>, vector<8x128xf32>
    %56 = math.log %51 : vector<8x128xf32>
    %57 = arith.addf %56, %16 : vector<8x128xf32>
    %58 = arith.subf %57, %54 : vector<8x128xf32>
    %59 = tpu.reciprocal %51 {approx = true} : vector<8x128xf32> -> vector<8x128xf32>
    %60 = arith.mulf %55, %59 : vector<8x128xf32>
    %c0_34 = arith.constant 0 : index
    %c0_35 = arith.constant 0 : index
    %c0_36 = arith.constant 0 : index
    %c0_37 = arith.constant 0 : index
    %61 = vector.load %arg4[%c0_34, %c0_35, %c0_36, %c0_37] : memref<1x3x8x128xf32, #tpu.memory_space<vmem>>, vector<1x1x8x128xf32>
    %62 = vector.shape_cast %61 : vector<1x1x8x128xf32> to vector<8x128xf32>
    %63 = vector.shape_cast %58 : vector<8x128xf32> to vector<1x1x8x128xf32>
    tpu.vector_store %arg4[%c0_34, %c0_35, %c0_36, %c0_37], %63 {strides = array<i32>} : memref<1x3x8x128xf32, #tpu.memory_space<vmem>>, vector<1x1x8x128xf32>,
    %cst_38 = arith.constant 1.000000e+00 : f32
    %64 = vector.broadcast %cst_38 : f32 to vector<8x128xf32>
    %65 = arith.select %3, %60, %64 : vector<8x128xi1>, vector<8x128xf32>
    %c0_39 = arith.constant 0 : index
    %c1_40 = arith.constant 1 : index
    %c0_41 = arith.constant 0 : index
    %c0_42 = arith.constant 0 : index
    %66 = vector.load %arg4[%c0_39, %c1_40, %c0_41, %c0_42] : memref<1x3x8x128xf32, #tpu.memory_space<vmem>>, vector<1x1x8x128xf32>
    %67 = vector.shape_cast %66 : vector<1x1x8x128xf32> to vector<8x128xf32>
    %68 = vector.shape_cast %65 : vector<8x128xf32> to vector<1x1x8x128xf32>
    tpu.vector_store %arg4[%c0_39, %c1_40, %c0_41, %c0_42], %68 {strides = array<i32>} : memref<1x3x8x128xf32, #tpu.memory_space<vmem>>, vector<1x1x8x128xf32>,
    %69 = arith.extui %3 : vector<8x128xi1> to vector<8x128xi32>
    %70 = arith.sitofp %69 : vector<8x128xi32> to vector<8x128xf32>
    %c0_43 = arith.constant 0 : index
    %c2_44 = arith.constant 2 : index
    %c0_45 = arith.constant 0 : index
    %c0_46 = arith.constant 0 : index
    %71 = vector.load %arg4[%c0_43, %c2_44, %c0_45, %c0_46] : memref<1x3x8x128xf32, #tpu.memory_space<vmem>>, vector<1x1x8x128xf32>
    %72 = vector.shape_cast %71 : vector<1x1x8x128xf32> to vector<8x128xf32>
    %73 = vector.shape_cast %70 : vector<8x128xf32> to vector<1x1x8x128xf32>
    tpu.vector_store %arg4[%c0_43, %c2_44, %c0_45, %c0_46], %73 {strides = array<i32>} : memref<1x3x8x128xf32, #tpu.memory_space<vmem>>, vector<1x1x8x128xf32>,
    return
  }
  func.func @transform_0(%arg0: i32, %arg1: i32) -> (i32, i32, i32, i32) {
    %c0_i32 = arith.constant 0 : i32
    %c0_i32_0 = arith.constant 0 : i32
    %c0_i32_1 = arith.constant 0 : i32
    return %arg0, %c0_i32, %arg1, %c0_i32_0 : i32, i32, i32, i32
  }
  func.func @transform_1(%arg0: i32, %arg1: i32) -> (i32, i32, i32) {
    %c0_i32 = arith.constant 0 : i32
    %c0_i32_0 = arith.constant 0 : i32
    return %arg0, %arg1, %c0_i32 : i32, i32, i32
  }
  func.func @transform_2(%arg0: i32, %arg1: i32) -> (i32, i32, i32, i32) {
    %c0_i32 = arith.constant 0 : i32
    %c0_i32_0 = arith.constant 0 : i32
    %c0_i32_1 = arith.constant 0 : i32
    return %arg0, %c0_i32, %arg1, %c0_i32_0 : i32, i32, i32, i32
  }
}

</mosaic_0001>

<bundles_post_ra>
// kernel: tpu_custom_call.1
= control target key start
LH: loop header
LB: loop body
LE: loop exit
PB: predicated region body
PF: predicated region fallthrough
CT: control target
= control target key end

     0   :  { %7 = vsyncpa [#allocation3], 0  ;;  %s828_s0 = inlined_call_operand.hbm [shape: f32[2,4,8,128], index: 0, kind: input, shape index: {}]   ;;  %s829_s1 = inlined_call_operand.hbm [shape: s32[2,8,128], index: 1, kind: input, shape index: {}]   ;;  %s830_s2 = inlined_call_operand.hbm [shape: f32[2,3,8,128], index: 2, kind: output, shape index: {}]  }
   0x1   :  { %9 = vsyncpa [#allocation3 + $0x1], 0 }
   0x2   :  { %10 = vsyncpa [#allocation6], 0 }
   0x3   :  { %12 = vsyncpa [#allocation6 + $0x1], 0 }
   0x4   :  { %13 = vsyncpa [#allocation4], 0 }
   0x5   :  { %15 = vsyncpa [#allocation4 + $0x1], 0  ;;  %s680_s9 = smov 0   ;;  %s682_s10 = smov 0  }
   0x6   :  { %s684_s11 = smov 0   ;;  %s686_s12 = smov 0  }
   0x7   :  { %s688_s13 = smov 0   ;;  %s690_s14 = smov 0  }
   0x8 LB: > { %s404_s15 = sadd.s32 4294967295, %s658_s14   ;;  %s405_s16 = sadd.s32 4294967294, %s658_s14   ;;  %s658_s14 = sphi %s690_s14, %s21_s14   ;;  %s654_s13 = sphi %s688_s13, %s840_s13   ;;  %s650_s12 = sphi %s686_s12, %s839_s12   ;;  %s646_s11 = sphi %s684_s11, %s838_s11   ;;  %s642_s10 = sphi %s682_s10, %s837_s10   ;;  %s638_s9 = sphi %s680_s9, %s836_s9  }
   0x9   : > { %s33_s17 = sadd.s32 1, %s654_s13  ;;  %s42_s18 = sadd.s32 1, %s646_s11 }
   0xa   : > { %p35_p0 = scmp.ge.s32.totalorder %s33_s17, 2  ;;  %p49_p1 = scmp.ne.s32.totalorder %s646_s11, %s642_s10 }
   0xb   : > { %p50_p2 = scmp.eq.s32.totalorder %s658_s14, 0  ;;  %p55_p3 = scmp.ne.s32.totalorder %s642_s10, %s638_s9 }
   0xc   : > { %s842_s17 = smov (%p35_p0, %s33_s17), 0  ;;  %p56_p5 = scmp.eq.s32.totalorder %s404_s15, 0 }
   0xd   : > { %p721_p4 = por %p50_p2, %p49_p1  ;;  %s37_s20 = ssub.s32 %s654_s13, %s842_s17 }
   0xe   : > { %p109_p6 = scmp.eq.s32.totalorder %s404_s15, 1  ;;  %p40_p7 = scmp.eq.s32.totalorder %s37_s20, 0 }
   0xf   : > { %p727_p8 = por %p56_p5, %p55_p3  ;;  %p115_p10 = scmp.eq.s32.totalorder %s405_s16, 1 }
  0x10   : > { %p731_p9 = por %p109_p6, %p49_p1  ;;  %p407_p12 = scmp.ge.s32.totalorder %s658_s14, 2 }
  0x11   : > { %s736_s23 = scalar_select %p40_p7, %s646_s11, %s42_s18  }
  0x12   : > { %p738_p11 = por %p115_p10, %p55_p3  ;;  %p445_p13 = scmp.lt.s32.totalorder %s658_s14, 2 }
  0x13   : > { %s135_s25 = sand.u32 1, %s646_s11   ;;  %s425_s27 = sshll.u32 %s654_s13, 5 }
  0x14   : > { %s408_s26 = sshll.u32 %s135_s25, 5  ;;  %s145_s30 = scalar_lea.hbm %s828_s0, %s425_s27 }
  0x15   : > { %s139_s3 = scalar_lea.vmem [#allocation2], %s408_s26  ;;  %s146_s5 = sshll.u32 %s145_s30, 4  ;;  %s147_s5 = int_to_ptr.hbm [resolvable:$true] %s146_s5 }
  0x16   : > { %s148_s4 = sshll.u32 %s139_s3, 4  ;;  %p751_p0 = pnand %p445_p13, %p721_p4  ;;  %s149_s4 = int_to_ptr.vmem [resolvable:$true] %s148_s4 }
  0x17   : > { %p413_p1 = scmp.ge.s32.totalorder %s658_s14, 1  ;;  %s136_s7 = scalar_lea.sflag [#allocation3], %s135_s25 }
  0x18   : > { %s660_s8 = smov 128   ;;  %s661_s15 = smov 8  }
  0x19   : > { %437 = dma.hbm_to_vmem [thread:$0]  (!%p751_p0), %s147_s5, 512, %s149_s4, %s136_s7, %s660_s8, %s660_s8, %s661_s15  }
  0x1a   : > { %p176_p2 = scmp.lt.s32.totalorder %s658_s14, 3  ;;  %s411_s16 = sshll.u32 %s135_s25, 3 }
  0x1b   : > { %s412_s18 = sshll.u32 %s654_s13, 3  ;;  %s162_s27 = scalar_lea.vmem [#allocation5], %s411_s16 }
  0x1c   : > { %p177_p3 = pnand %p413_p1, %p176_p2  ;;  %s167_s19 = scalar_lea.hbm %s829_s1, %s412_s18 }
  0x1d   : > { %s171_s28 = sshll.u32 %s162_s27, 4  ;;  %s169_s29 = sshll.u32 %s167_s19, 4  ;;  %s172_s28 = int_to_ptr.vmem [resolvable:$true] %s171_s28  ;;  %s170_s29 = int_to_ptr.hbm [resolvable:$true] %s169_s29 }
  0x1e   : > { %s159_s30 = scalar_lea.sflag [#allocation6], %s135_s25  ;;  %180 = sbr.rel (%p177_p3) target bundleno = 81 (0x51), region = 28 }
  0x1f   : > { %440 = dma.hbm_to_vmem [thread:$0]  (!%p751_p0), %s170_s29, 128, %s172_s28, %s159_s30  }
  0x20   : > { %s766_s3 = sand.u32 (!%p177_p3), 1, %s642_s10  }
  0x21   : > { %s414_s4 = sshll.u32 (!%p177_p3), %s766_s3, 5  ;;  %s183_s5 = scalar_lea.sflag (!%p177_p3), [#allocation3], %s766_s3 }
  0x22   : > { %s186_s7 = scalar_lea.vmem (!%p177_p3), [#allocation2], %s414_s4 }
  0x23   : > { %625 = dma.done.wait (%p727_p8), %s183_s5, 512  }
  0x24   : > { %627 = vsyncadd (%p727_p8), %s183_s5, 4294966784  ;;  %s415_s25 = sshll.u32 %s766_s3, 3  ;;  %s193_s6 = scalar_lea.sflag [#allocation6], %s766_s3 }
  0x25   : > { %s196_s8 = scalar_lea.vmem [#allocation5], %s415_s25 }
  0x26   : > { %629 = dma.done.wait (%p727_p8), %s193_s6, 128  }
  0x27   : > { %631 = vsyncadd (%p727_p8), %s193_s6, 4294967168  ;;  %s426_s15 = smul.u32 24, %s766_s3  ;;  %v226_v0 = vld [vmem:[%s186_s7] sm:$0xff]  ;;  %v416_v1 = vld [vmem:[%s186_s7 + $0x8] sm:$0xff]  ;;  %v662_v8 = vmov 0.0   ;;  %s279_s27 = scalar_lea.sflag [#allocation4], %s766_s3 }
  0x28   : > { %v223_v2 = vld [vmem:[%s196_s8] sm:$0xff]  ;;  %v229_v3 = vmax.f32 %v226_v0, %v416_v1  ;;  %v417_v4 = vld [vmem:[%s186_s7 + $0x10] sm:$0xff]  ;;  %v418_v5 = vld [vmem:[%s186_s7 + $0x18] sm:$0xff]  ;;  %s427_s21 = smul.u32 24, %s650_s12  ;;  %s592_s5 = scalar_lea.hbm %s830_s2, 48 }
  0x29   : > { %vm224_vm0 = vcmp.ne.s32.totalorder %v223_v2, 4294967295  ;;  %s782_s16 = scalar_lea.vmem [#allocation7], %s426_s15 }
  0x2a   : > { %v232_v6 = vmax.f32 %v229_v3, %v417_v4  ;;  %v420_v9 = vsel %vm224_vm0, 1.0, %v662_v8  ;;  %v225_v18 = vsel %vm224_vm0, %v223_v2, 0  ;;  %s291_s26 = scalar_lea.hbm %s830_s2, %s427_s21  ;;  %s292_s19 = sshll.u32 %s782_s16, 4  ;;  %s293_s19 = int_to_ptr.vmem [resolvable:$true] %s292_s19 }
  0x2b   : > { %421 = vst [vmem:[%s782_s16 + $0x10] sm:$0xff] %v420_v9  ;;  %vm240_vm1 = vcmp.eq.s32.totalorder %v225_v18, 0  ;;  %vm247_vm2 = vcmp.eq.s32.totalorder %v225_v18, 1  ;;  %vm254_vm3 = vcmp.eq.s32.totalorder %v225_v18, 2  ;;  %vm261_vm4 = vcmp.eq.s32.totalorder %v225_v18, 3  ;;  %s294_s12 = sshll.u32 %s291_s26, 4  ;;  %s295_s12 = int_to_ptr.hbm [resolvable:$true] %s294_s12 }
  0x2c   : > { %v235_v7 = vmax.f32 %v232_v6, %v418_v5  ;;  %v241_v27 = vsel %vm240_vm1, %v226_v0, 0.0  ;;  %s586_s28 = sshra.s32 %s295_s12, 4  ;;  %s587_s28 = int_to_ptr.hbm [resolvable:$true] %s586_s28 }
  0x2d   : > { %v248_v29 = vsel %vm247_vm2, %v416_v1, %v241_v27  ;;  %s588_s29 = scalar_lea.hbm %s587_s28, 24  ;;  %p593_p7 = scmp.lt.s32.totalorder %s587_s28, %s830_s2 }
  0x2e   : > { %v236_v10 = vsub.f32 %v226_v0, %v235_v7  ;;  %v243_v11 = vsub.f32 %v416_v1, %v235_v7  ;;  %v250_v12 = vsub.f32 %v417_v4, %v235_v7  ;;  %v257_v13 = vsub.f32 %v418_v5, %v235_v7  ;;  %p589_p4 = scmp.ne.s32.totalorder %s587_s28, %s588_s29  ;;  %p594_p8 = scmp.lt.s32.totalorder %s592_s5, %s588_s29 }
  0x2f   : > { %v255_v31 = vsel %vm254_vm3, %v417_v4, %v248_v29 }
  0x30   : > { %v237_v14 = vmul.f32 1.442695, %v236_v10  ;;  %v244_v15 = vmul.f32 1.442695, %v243_v11  ;;  %v251_v16 = vmul.f32 1.442695, %v250_v12  ;;  %v262_v36 = vsel %vm261_vm4, %v418_v5, %v255_v31  ;;  %p590_p5 = pnand %p589_p4, %p731_p9  ;;  %p595_p10 = por %p594_p8, %p593_p7 }
  0x31   : > { %v258_v17 = vmul.f32 1.442695, %v257_v13 }
  0x32   : > { %500 = vpow2.f32 %v237_v14  ;;  %p591_p6 = pneg %p590_p5 }
  0x33   : > { %502 = vpow2.f32 %v244_v15 }
  0x34   : > { %504 = vpow2.f32 %v251_v16  ;;  %p596_p13 = pnand %p595_p10, %p591_p6 }
  0x35   : > { %506 = vpow2.f32 %v258_v17 }
  0x38   : > { %v501_v19 = vpop.eup %500 }
  0x39   : > { %v503_v20 = vpop.eup %502  ;;  %v242_v25 = vsel %vm240_vm1, %v501_v19, 0.0 }
  0x3a   : > { %v505_v21 = vpop.eup %504  ;;  %v246_v22 = vadd.f32 %v503_v20, %v501_v19  ;;  %v249_v28 = vsel %vm247_vm2, %v503_v20, %v242_v25 }
  0x3b   : > { %v507_v23 = vpop.eup %506  ;;  %v256_v30 = vsel %vm254_vm3, %v505_v21, %v249_v28 }
  0x3c   : > { %v253_v24 = vadd.f32 %v505_v21, %v246_v22  ;;  %v263_v32 = vsel %vm261_vm4, %v507_v23, %v256_v30 }
  0x3e   : > { %v260_v26 = vadd.f32 %v507_v23, %v253_v24 }
  0x40   : > { %508 = vlog2.f32 %v260_v26 }
  0x41   : > { %510 = vrcp.f32 %v260_v26 }
  0x46   : > { %v509_v33 = vpop.eup %508 }
  0x47   : > { %v511_v34 = vpop.eup %510  ;;  %v265_v35 = vmul.f32 0.6931472, %v509_v33 }
  0x48   : > { %v269_v37 = vmul.f32 %v511_v34, %v263_v32 }
  0x49   : > { %v266_v38 = vadd.f32 %v265_v35, %v235_v7 }
  0x4a   : > { %v271_v39 = vsel %vm224_vm0, %v269_v37, 1.0 }
  0x4b   : > { %v267_v40 = vsub.f32 %v266_v38, %v262_v36  ;;  %419 = vst [vmem:[%s782_s16 + $0x8] sm:$0xff] %v271_v39 }
  0x4d   : > { %270 = vst [vmem:[%s782_s16] sm:$0xff] %v267_v40 }
  0x4e   : > { %599 = shalt.err (!%p596_p13)
}
  0x4f   : > { %s663_s3 = smov 128   ;;  %s664_s6 = smov 8  }
  0x50   : > { %432 = dma.vmem_to_hbm [thread:$0]  (%p731_p9), %s293_s19, 384, %s295_s12, %s279_s27, %s663_s3, %s663_s3, %s664_s6  }
  0x51 PF: > { %s309_s8 = sand.u32 1, %s638_s9   ;;  %p442_p0 = pnand %p407_p12, %p738_p11 }
  0x52   : > { %s310_s15 = scalar_lea.sflag [#allocation4], %s309_s8 }
  0x53   : > { %p443_p1 = pneg %p442_p0 }
  0x55   : > { %633 = dma.done.wait (%p443_p1), %s310_s15, 384  }
  0x56   : > { %635 = vsyncadd (%p443_p1), %s310_s15, 4294966912  ;;  %s21_s14 = sadd.s32 1, %s658_s14   ;;  %s836_s9 = smov %s642_s10 }
  0x57   : > { %p18_p2 = scmp.ge.s32.totalorder %s21_s14, 4   ;;  %s837_s10 = smov %s646_s11 }
  0x58   : > { %s838_s11 = smov %s736_s23  ;;  %s839_s12 = smov %s654_s13 }
  0x59   : > { %s840_s13 = smov %s842_s17  ;;  %20 = sbr.rel (!%p18_p2) target bundleno = 8 (0x8), region = 91 }
  0x5e   :  { %316 = vsyncpa [#allocation3], 1 }
  0x5f   :  { %318 = vsyncpa [#allocation3 + $0x1], 1 }
  0x60   :  { %319 = vsyncpa [#allocation6], 1 }
  0x61   :  { %321 = vsyncpa [#allocation6 + $0x1], 1 }
  0x62   :  { %322 = vsyncpa [#allocation4], 1 }
  0x63   :  { %324 = vsyncpa [#allocation4 + $0x1], 1 }

</bundles_post_ra>
